<compile_context>
chip_gen: v7x
topology: tpu7x:2x2x1
jax: 0.10.0
libtpu: 0.0.40
codegen_flags: <defaults>
</compile_context>

<pallas_src>
import functools

import jax
import jax.numpy as jnp
from jax.experimental import pallas as pl
from jax.experimental.pallas import tpu as pltpu

IN_FEATS = 7       # state dim
H1 = 256
H2 = 128
OUT_FEATS = 5      # number of actions
K_PAD = 8          # padded contraction dim for layer 1 (full-dim block)
OUT_PAD = 128      # lane-dense padded output width
BATCH_ALIGN = 16   # bf16 sublane packing alignment for the batch tile
MAX_TILE_B = 512   # cap on batch tile (keeps VMEM use batch-independent)


def _round_up(x, m):
    return (x + m - 1) // m * m


def _qnet_kernel(x_ref, w1_ref, b1_ref, w2_ref, b2_ref, w3_ref, b3_ref, o_ref):
    # x_ref : (TB, K_PAD)   bf16     w1_ref: (K_PAD, H1)   bf16   b1_ref: (1, H1)      f32
    # w2_ref: (H1, H2)      bf16     b2_ref: (1, H2)       f32
    # w3_ref: (H2, OUT_PAD) bf16     b3_ref: (1, OUT_PAD)  f32
    # o_ref : (TB, OUT_PAD) f32   (only the first OUT_FEATS columns are meaningful)
    x = x_ref[...]
    h1 = jnp.dot(x, w1_ref[...], preferred_element_type=jnp.float32)
    h1 = jnp.maximum(h1 + b1_ref[...], 0.0)                  # f32 VPU (v5e-safe)
    h2 = jnp.dot(h1.astype(jnp.bfloat16), w2_ref[...],
                 preferred_element_type=jnp.float32)
    h2 = jnp.maximum(h2 + b2_ref[...], 0.0)
    out = jnp.dot(h2.astype(jnp.bfloat16), w3_ref[...],
                  preferred_element_type=jnp.float32) + b3_ref[...]
    o_ref[...] = out.astype(o_ref.dtype)


def prepare_params(params):
    """One-time packing of nn.Linear-style params (W: (out, in), b: (out,)).

    This is the hoisted weight-packing step; do NOT call it per forward.
    """
    w1, b1, w2, b2, w3, b3 = params
    w1_p = jnp.zeros((K_PAD, H1), jnp.bfloat16).at[:IN_FEATS, :].set(
        w1.T.astype(jnp.bfloat16))                            # (7,256) -> (8,256)
    w2_t = w2.T.astype(jnp.bfloat16)                          # (256,128)
    w3_p = jnp.zeros((H2, OUT_PAD), jnp.bfloat16).at[:, :OUT_FEATS].set(
        w3.T.astype(jnp.bfloat16))                            # (128,5) -> (128,128)
    b1_p = b1.reshape(1, H1).astype(jnp.float32)
    b2_p = b2.reshape(1, H2).astype(jnp.float32)
    b3_p = jnp.zeros((1, OUT_PAD), jnp.float32).at[0, :OUT_FEATS].set(
        b3.astype(jnp.float32))
    return (w1_p, b1_p, w2_t, b2_p, w3_p, b3_p)


@functools.partial(jax.jit, static_argnames=("block_b",))
def qlearning_forward(x, packed, block_b=MAX_TILE_B):
    """x: (B, 7) float -> (B, 5) float32, matching QLearning.forward."""
    w1_p, b1_p, w2_t, b2_p, w3_p, b3_p = packed
    B = x.shape[0]

    # Batch tile: multiple of 16 (bf16 sublane), capped, batch-independent VMEM.
    block_b = max(BATCH_ALIGN, _round_up(min(block_b, MAX_TILE_B), BATCH_ALIGN))
    TB = min(block_b, _round_up(B, BATCH_ALIGN))
    Bp = _round_up(B, TB)
    grid = (Bp // TB,)

    # Only activation padding happens per call (weights are already packed).
    x_p = jnp.zeros((Bp, K_PAD), jnp.bfloat16)
    x_p = x_p.at[:B, :IN_FEATS].set(x.astype(jnp.bfloat16))

    flops = 2 * Bp * (K_PAD * H1 + H1 * H2 + H2 * OUT_PAD)
    bytes_accessed = (
        Bp * K_PAD * 2                                   # x (bf16)
        + (K_PAD * H1 + H1 * H2 + H2 * OUT_PAD) * 2      # weights (bf16)
        + (H1 + H2 + OUT_PAD) * 4                        # biases (f32)
        + Bp * OUT_PAD * 4                               # output (f32)
    )

    out_padded = pl.pallas_call(
        _qnet_kernel,
        out_shape=jax.ShapeDtypeStruct((Bp, OUT_PAD), jnp.float32),
        grid=grid,
        in_specs=[
            pl.BlockSpec((TB, K_PAD), lambda i: (i, 0)),      # x streams over batch
            pl.BlockSpec((K_PAD, H1), lambda i: (0, 0)),      # weights stay resident
            pl.BlockSpec((1, H1), lambda i: (0, 0)),
            pl.BlockSpec((H1, H2), lambda i: (0, 0)),
            pl.BlockSpec((1, H2), lambda i: (0, 0)),
            pl.BlockSpec((H2, OUT_PAD), lambda i: (0, 0)),
            pl.BlockSpec((1, OUT_PAD), lambda i: (0, 0)),
        ],
        out_specs=pl.BlockSpec((TB, OUT_PAD), lambda i: (i, 0)),
        compiler_params=pltpu.CompilerParams(
            dimension_semantics=("parallel",)),               # v7x: 2 TCs split batch
        cost_estimate=pl.CostEstimate(
            flops=flops, transcendentals=0, bytes_accessed=bytes_accessed),
    )(x_p, w1_p, b1_p, w2_t, b2_p, w3_p, b3_p)

    return out_padded[:B, :OUT_FEATS]


def init_params(key):
    """Deterministic synthetic init matching nn.Linear shapes (W: (out, in))."""
    k1, k2, k3, k4, k5, k6 = jax.random.split(key, 6)

    def linear(kw, kb, fan_in, fan_out):
        bound = 1.0 / jnp.sqrt(fan_in)
        w = jax.random.uniform(kw, (fan_out, fan_in), jnp.float32, -bound, bound)
        b = jax.random.uniform(kb, (fan_out,), jnp.float32, -bound, bound)
        return w, b

    w1, b1 = linear(k1, k2, IN_FEATS, H1)
    w2, b2 = linear(k3, k4, H1, H2)
    w3, b3 = linear(k5, k6, H2, OUT_FEATS)
    return (w1, b1, w2, b2, w3, b3)


def _reference(x, params):
    """Pure-JAX reference mirroring the kernel's bf16 storage precision."""
    w1, b1, w2, b2, w3, b3 = params
    rnd = lambda a: a.astype(jnp.bfloat16).astype(jnp.float32)
    h1 = jnp.maximum(rnd(x) @ rnd(w1).T + b1, 0.0)
    h1 = rnd(h1)
    h2 = jnp.maximum(h1 @ rnd(w2).T + b2, 0.0)
    h2 = rnd(h2)
    return h2 @ rnd(w3).T + b3


# TODO(synk): replay-buffer management, epsilon-greedy action selection and the
# MSE training loss are host-side RL bookkeeping, not kernel work; only
# QLearning.forward is implemented as a Pallas kernel.

if __name__ == "__main__":
    key = jax.random.PRNGKey(0)
    kp, kx = jax.random.split(key)
    params = init_params(kp)
    packed = prepare_params(params)           # one-time weight packing (hoisted)

    batch = 64                                # QLearning default batch_size
    x = jax.random.normal(kx, (batch, IN_FEATS), jnp.float32)

    out = qlearning_forward(x, packed)
    out = jax.block_until_ready(out)

    ref = _reference(x, params)
    assert out.shape == (batch, OUT_FEATS)
    max_err = float(jnp.max(jnp.abs(out - ref)))
    assert jnp.allclose(out, ref, atol=1e-2, rtol=1e-2), max_err

    print("KERNEL_OK")
</pallas_src>

<mosaic_0001>
module attributes {stable_mosaic.version = 11 : i64} {
  func.func @_qnet_kernel(%arg0: i32, %arg1: memref<64x8xbf16, #tpu.memory_space<vmem>>, %arg2: memref<8x256xbf16, #tpu.memory_space<vmem>>, %arg3: memref<1x256xf32, #tpu.memory_space<vmem>>, %arg4: memref<256x128xbf16, #tpu.memory_space<vmem>>, %arg5: memref<1x128xf32, #tpu.memory_space<vmem>>, %arg6: memref<128x128xbf16, #tpu.memory_space<vmem>>, %arg7: memref<1x128xf32, #tpu.memory_space<vmem>>, %arg8: memref<64x128xf32, #tpu.memory_space<vmem>>) attributes {dimension_semantics = [#tpu.dimension_semantics<parallel>], iteration_bounds = array<i64: 1>, scalar_prefetch = 0 : i64, scratch_operands = 0 : i64, tpu.core_type = #tpu.core_type<tc>, window_params = [{transform_indices = @transform_0, window_bounds = array<i64: 64, 8>}, {pipeline_mode = #tpu.pipeline_mode<synchronous>, transform_indices = @transform_1, window_bounds = array<i64: 8, 256>}, {pipeline_mode = #tpu.pipeline_mode<synchronous>, transform_indices = @transform_2, window_bounds = array<i64: 1, 256>}, {pipeline_mode = #tpu.pipeline_mode<synchronous>, transform_indices = @transform_3, window_bounds = array<i64: 256, 128>}, {pipeline_mode = #tpu.pipeline_mode<synchronous>, transform_indices = @transform_4, window_bounds = array<i64: 1, 128>}, {pipeline_mode = #tpu.pipeline_mode<synchronous>, transform_indices = @transform_5, window_bounds = array<i64: 128, 128>}, {pipeline_mode = #tpu.pipeline_mode<synchronous>, transform_indices = @transform_6, window_bounds = array<i64: 1, 128>}, {transform_indices = @transform_7, window_bounds = array<i64: 64, 128>}]} {
    %c0 = arith.constant 0 : index
    %c0_0 = arith.constant 0 : index
    %0 = vector.load %arg1[%c0, %c0_0] : memref<64x8xbf16, #tpu.memory_space<vmem>>, vector<64x8xbf16>
    %c0_1 = arith.constant 0 : index
    %c0_2 = arith.constant 0 : index
    %1 = vector.load %arg2[%c0_1, %c0_2] : memref<8x256xbf16, #tpu.memory_space<vmem>>, vector<8x256xbf16>
    %cst = arith.constant dense<0.000000e+00> : vector<64x256xf32>
    %2 = tpu.matmul %0, %1, %cst {dimension_numbers = #tpu.dot_dimension_numbers<[1], [0], [0], [1], [0, 0, 1, 1], [], []>} : vector<64x8xbf16>, vector<8x256xbf16>, vector<64x256xf32> -> vector<64x256xf32>
    %c0_3 = arith.constant 0 : index
    %c0_4 = arith.constant 0 : index
    %3 = vector.load %arg3[%c0_3, %c0_4] : memref<1x256xf32, #tpu.memory_space<vmem>>, vector<1x256xf32>
    %4 = vector.broadcast %3 : vector<1x256xf32> to vector<64x256xf32>
    %5 = arith.addf %2, %4 : vector<64x256xf32>
    %cst_5 = arith.constant 0.000000e+00 : f32
    %6 = vector.broadcast %cst_5 : f32 to vector<64x256xf32>
    %7 = arith.maximumf %5, %6 : vector<64x256xf32>
    %8 = arith.truncf %7 : vector<64x256xf32> to vector<64x256xbf16>
    %c0_6 = arith.constant 0 : index
    %c0_7 = arith.constant 0 : index
    %9 = vector.load %arg4[%c0_6, %c0_7] : memref<256x128xbf16, #tpu.memory_space<vmem>>, vector<256x128xbf16>
    %cst_8 = arith.constant dense<0.000000e+00> : vector<64x128xf32>
    %10 = tpu.matmul %8, %9, %cst_8 {dimension_numbers = #tpu.dot_dimension_numbers<[1], [0], [0], [1], [0, 0, 1, 1], [], []>} : vector<64x256xbf16>, vector<256x128xbf16>, vector<64x128xf32> -> vector<64x128xf32>
    %c0_9 = arith.constant 0 : index
    %c0_10 = arith.constant 0 : index
    %11 = vector.load %arg5[%c0_9, %c0_10] : memref<1x128xf32, #tpu.memory_space<vmem>>, vector<1x128xf32>
    %12 = vector.broadcast %11 : vector<1x128xf32> to vector<64x128xf32>
    %13 = arith.addf %10, %12 : vector<64x128xf32>
    %cst_11 = arith.constant 0.000000e+00 : f32
    %14 = vector.broadcast %cst_11 : f32 to vector<64x128xf32>
    %15 = arith.maximumf %13, %14 : vector<64x128xf32>
    %16 = arith.truncf %15 : vector<64x128xf32> to vector<64x128xbf16>
    %c0_12 = arith.constant 0 : index
    %c0_13 = arith.constant 0 : index
    %17 = vector.load %arg6[%c0_12, %c0_13] : memref<128x128xbf16, #tpu.memory_space<vmem>>, vector<128x128xbf16>
    %cst_14 = arith.constant dense<0.000000e+00> : vector<64x128xf32>
    %18 = tpu.matmul %16, %17, %cst_14 {dimension_numbers = #tpu.dot_dimension_numbers<[1], [0], [0], [1], [0, 0, 1, 1], [], []>} : vector<64x128xbf16>, vector<128x128xbf16>, vector<64x128xf32> -> vector<64x128xf32>
    %c0_15 = arith.constant 0 : index
    %c0_16 = arith.constant 0 : index
    %19 = vector.load %arg7[%c0_15, %c0_16] : memref<1x128xf32, #tpu.memory_space<vmem>>, vector<1x128xf32>
    %20 = vector.broadcast %19 : vector<1x128xf32> to vector<64x128xf32>
    %21 = arith.addf %18, %20 : vector<64x128xf32>
    %c0_17 = arith.constant 0 : index
    %c0_18 = arith.constant 0 : index
    %22 = vector.load %arg8[%c0_17, %c0_18] : memref<64x128xf32, #tpu.memory_space<vmem>>, vector<64x128xf32>
    tpu.vector_store %arg8[%c0_17, %c0_18], %21 {strides = array<i32>} : memref<64x128xf32, #tpu.memory_space<vmem>>, vector<64x128xf32>,
    return
  }
  func.func @transform_0(%arg0: i32) -> (i32, i32) {
    %c0_i32 = arith.constant 0 : i32
    %c0_i32_0 = arith.constant 0 : i32
    return %arg0, %c0_i32 : i32, i32
  }
  func.func @transform_1(%arg0: i32) -> (i32, i32) {
    %c0_i32 = arith.constant 0 : i32
    %c0_i32_0 = arith.constant 0 : i32
    %c0_i32_1 = arith.constant 0 : i32
    return %c0_i32, %c0_i32_0 : i32, i32
  }
  func.func @transform_2(%arg0: i32) -> (i32, i32) {
    %c0_i32 = arith.constant 0 : i32
    %c0_i32_0 = arith.constant 0 : i32
    %c0_i32_1 = arith.constant 0 : i32
    return %c0_i32, %c0_i32_0 : i32, i32
  }
  func.func @transform_3(%arg0: i32) -> (i32, i32) {
    %c0_i32 = arith.constant 0 : i32
    %c0_i32_0 = arith.constant 0 : i32
    %c0_i32_1 = arith.constant 0 : i32
    return %c0_i32, %c0_i32_0 : i32, i32
  }
  func.func @transform_4(%arg0: i32) -> (i32, i32) {
    %c0_i32 = arith.constant 0 : i32
    %c0_i32_0 = arith.constant 0 : i32
    %c0_i32_1 = arith.constant 0 : i32
    return %c0_i32, %c0_i32_0 : i32, i32
  }
  func.func @transform_5(%arg0: i32) -> (i32, i32) {
    %c0_i32 = arith.constant 0 : i32
    %c0_i32_0 = arith.constant 0 : i32
    %c0_i32_1 = arith.constant 0 : i32
    return %c0_i32, %c0_i32_0 : i32, i32
  }
  func.func @transform_6(%arg0: i32) -> (i32, i32) {
    %c0_i32 = arith.constant 0 : i32
    %c0_i32_0 = arith.constant 0 : i32
    %c0_i32_1 = arith.constant 0 : i32
    return %c0_i32, %c0_i32_0 : i32, i32
  }
  func.func @transform_7(%arg0: i32) -> (i32, i32) {
    %c0_i32 = arith.constant 0 : i32
    %c0_i32_0 = arith.constant 0 : i32
    return %arg0, %c0_i32 : i32, i32
  }
}

</mosaic_0001>

<bundles_post_ra>
// kernel: qlearning_forward.1
= control target key start
LH: loop header
LB: loop body
LE: loop exit
PB: predicated region body
PF: predicated region fallthrough
CT: control target
= control target key end

     0   :  { %12 = vsyncpa [#allocation3], 0  ;;  %s736_s24 = smov [#allocation2]   ;;  %s868_s0 = inlined_call_operand.vmem [shape: bf16[64,8], index: 0, kind: input, shape index: {}]   ;;  %s869_s1 = inlined_call_operand.vmem [shape: bf16[8,256], index: 1, kind: input, shape index: {}]   ;;  %s870_s2 = inlined_call_operand.vmem [shape: f32[1,256], index: 2, kind: input, shape index: {}]   ;;  %s871_s3 = inlined_call_operand.hbm [shape: bf16[256,128], index: 3, kind: input, shape index: {}]   ;;  %s872_s4 = inlined_call_operand.vmem [shape: f32[1,128], index: 4, kind: input, shape index: {}]   ;;  %s873_s5 = inlined_call_operand.vmem [shape: bf16[128,128], index: 5, kind: input, shape index: {}]   ;;  %s874_s6 = inlined_call_operand.vmem [shape: f32[1,128], index: 6, kind: input, shape index: {}]   ;;  %s875_s7 = inlined_call_operand.vmem [shape: f32[64,128], index: 7, kind: output, shape index: {}]  }
   0x1   :  { %s24_s25 = sshll.u32 %s736_s24, 4  ;;  %s712_s28 = scalar_lea.hbm %s871_s3, 2048  ;;  %s25_s25 = int_to_ptr.vmem [resolvable:$true] %s24_s25 }
   0x2   :  { %p713_p0 = scmp.ne.s32.totalorder %s871_s3, %s712_s28  ;;  %p716_p1 = scmp.lt.u32.totalorder %s712_s28, %s871_s3 }
   0x4   :  { %p718_p2 = pnand %p716_p1, %p713_p0 }
   0x6   :  { %721 = shalt.err (!%p718_p2)
}
   0x7   :  { %s722_s10 = scalar_lea.vmem %s25_s25, 2048  ;;  %p727_p4 = scmp.lt.s32.totalorder %s25_s25, %s25_s25 }
   0x8   :  { %p723_p3 = scmp.ne.s32.totalorder %s25_s25, %s722_s10  ;;  %p728_p5 = scmp.lt.s32.totalorder %s722_s10, %s722_s10 }
   0xa   :  { %p729_p6 = por %p728_p5, %p727_p4 }
   0xc   :  { %p730_p7 = pnand %p729_p6, %p723_p3 }
   0xe   :  { %733 = shalt.err (!%p730_p7)
}
   0xf   :  { %s737_s11 = smov 64   ;;  %s738_s12 = smov 4  }
  0x10   :  { %30 = dma.hbm_to_vmem [thread:$0]  %s871_s3, 2048, %s25_s25, [#allocation3], %s737_s11, %s737_s11, %s738_s12  }
  0x11   :  { %734 = dma.done.wait [#allocation3], 2048  }
  0x12   :  { %735 = vsyncadd [#allocation3], 4294965248  ;;  %v739_v0 = vmov 0   ;;  %v49_v1 = vld [vmem:[%s869_s1] sm:$0xff]  ;;  %vm100_vm0 = vcmask 1043456   ;;  %vm87_vm1 = vcmask 64512   ;;  %v52_v28 = vlaneseq }
  0x13   :  { %139 = vmatprep.mubr.bf16.mxu0 %v739_v0  ;;  %v570_v2 = vcombine.high %v49_v1, %v49_v1  ;;  %v569_v3 = vcombine.low %v49_v1, %v49_v1  ;;  %v684_v5 = vld [vmem:[%s868_s0] sm:$0xff]   ;;  %v690_v8 = vld [vmem:[#allocation2 + $0x48] sm:$0xff]   ;;  %v692_v10 = vld [vmem:[#allocation2 + $0x50] sm:$0xff]  }
  0x14   :  { %v688_v6 = vld [vmem:[#allocation2 + $0x40] sm:$0xff]   ;;  %v691_v9 = vld [vmem:[#allocation2 + $0x8] sm:$0xff]   ;;  %v693_v12 = vld [vmem:[#allocation2 + $0x10] sm:$0xff]   ;;  %v53_v29 = vshrl.u32 %v52_v28, 7 }
  0x15   :  { %571 = vmatprep.subr.msk.bf16.mxu0 %vm100_vm0, %v570_v2  ;;  %v102_v4 = vsel %vm100_vm0, %v569_v3, 0  ;;  %v689_v7 = vld [vmem:[#allocation2] sm:$0xff]   ;;  %602 = vmatprep.subr.bf16.mxu1 %v688_v6  ;;  %v685_v11 = vld [vmem:[%s868_s0 + $0x8] sm:$0xff]   ;;  %v694_v13 = vld [vmem:[#allocation2 + $0x58] sm:$0xff]  }
  0x16   :  { %108 = vmatpush1.bf16.msra.mxu0 %v102_v4  ;;  %603 = vmatpush3.bf16.msra.mxu1 %v689_v7  ;;  %v695_v14 = vld [vmem:[#allocation2 + $0x18] sm:$0xff]   ;;  %v696_v15 = vld [vmem:[#allocation2 + $0x60] sm:$0xff]   ;;  %v686_v16 = vld [vmem:[%s868_s0 + $0x10] sm:$0xff]   ;;  %v54_v30 = vsub.s32 0, %v53_v29  ;;  %v58_v32 = vsub.s32 1, %v53_v29 }
  0x17   :  { %604 = vmatprep.subr.bf16.mxu1 %v690_v8  ;;  %v697_v17 = vld [vmem:[#allocation2 + $0x20] sm:$0xff]   ;;  %v698_v18 = vld [vmem:[#allocation2 + $0x68] sm:$0xff]   ;;  %v687_v19 = vld [vmem:[%s868_s0 + $0x18] sm:$0xff]  }
  0x18   :  { %v699_v20 = vld [vmem:[#allocation2 + $0x28] sm:$0xff]   ;;  %v700_v21 = vld [vmem:[#allocation2 + $0x70] sm:$0xff]   ;;  %v702_v23 = vld [vmem:[#allocation2 + $0x78] sm:$0xff]  }
  0x19   :  { %572 = vmatmul.mubr.msk.bf16.vlgmr.msra.gmra.mrb[0].mxu0 %vm87_vm1, %v684_v5  ;;  %v701_v22 = vld [vmem:[#allocation2 + $0x30] sm:$0xff]   ;;  %v703_v24 = vld [vmem:[#allocation2 + $0x38] sm:$0xff]   ;;  %v704_v25 = vld [vmem:[%s873_s5] sm:$0xff]  }
  0x1a   :  { %149 = vmatprep.mubr.bf16.mxu0 %v739_v0  ;;  %605 = vmatpush3.bf16.msra.mxu1 %v691_v9  ;;  %v705_v26 = vld [vmem:[%s873_s5 + $0x8] sm:$0xff]   ;;  %v706_v27 = vld [vmem:[%s873_s5 + $0x10] sm:$0xff]   ;;  %v50_v31 = vld [vmem:[%s870_s2] sm:$0x3] }
  0x1b   :  { %606 = vmatprep.subr.bf16.mxu1 %v692_v10  ;;  %654 = vmatprep.subr.bf16.mxu0 %v704_v25  ;;  %v55_v33 = vrot.slane %v50_v31, %v54_v30  ;;  %v59_v34 = vrot.slane %v50_v31, %v58_v32  ;;  %v708_v28 = vld [vmem:[%s873_s5 + $0x20] sm:$0xff]   ;;  %v709_v29 = vld [vmem:[%s873_s5 + $0x28] sm:$0xff]   ;;  %v710_v30 = vld [vmem:[%s873_s5 + $0x30] sm:$0xff]  }
  0x1c   :  { %655 = vmatpush3.bf16.msra.mxu0 %v704_v25  ;;  %v711_v31 = vld [vmem:[%s873_s5 + $0x38] sm:$0xff]  }
  0x1d   :  { %656 = vmatprep.subr.bf16.mxu0 %v705_v26 }
  0x1e   :  { %607 = vmatpush3.bf16.msra.mxu1 %v693_v12 }
  0x1f   :  { %608 = vmatprep.subr.bf16.mxu1 %v694_v13 }
  0x20   :  { %657 = vmatpush3.bf16.msra.mxu0 %v705_v26 }
  0x21   :  { %573 = vmatmul.mubr.msk.bf16.gmra.mrb[4].mxu0 %vm87_vm1, %v685_v11  ;;  %658 = vmatprep.subr.bf16.mxu0 %v706_v27 }
  0x22   :  { %159 = vmatprep.mubr.bf16.mxu0 %v739_v0  ;;  %609 = vmatpush3.bf16.msra.mxu1 %v695_v14 }
  0x23   :  { %610 = vmatprep.subr.bf16.mxu1 %v696_v15 }
  0x24   :  { %659 = vmatpush3.bf16.msra.mxu0 %v706_v27  ;;  %v707_v27 = vld [vmem:[%s873_s5 + $0x18] sm:$0xff]  }
  0x25   :  { %660 = vmatprep.subr.bf16.mxu0 %v707_v27 }
  0x26   :  { %611 = vmatpush3.bf16.msra.mxu1 %v697_v17 }
  0x27   :  { %612 = vmatprep.subr.bf16.mxu1 %v698_v18 }
  0x28   :  { %661 = vmatpush3.bf16.msra.mxu0 %v707_v27 }
  0x29   :  { %574 = vmatmul.mubr.msk.bf16.gmra.mrb[8].mxu0 %vm87_vm1, %v686_v16  ;;  %662 = vmatprep.subr.bf16.mxu0 %v708_v28 }
  0x2a   :  { %169 = vmatprep.mubr.bf16.mxu0 %v739_v0  ;;  %613 = vmatpush3.bf16.msra.mxu1 %v699_v20 }
  0x2b   :  { %614 = vmatprep.subr.bf16.mxu1 %v700_v21 }
  0x2c   :  { %663 = vmatpush3.bf16.msra.mxu0 %v708_v28 }
  0x2d   :  { %664 = vmatprep.subr.bf16.mxu0 %v709_v29 }
  0x2e   :  { %615 = vmatpush3.bf16.msra.mxu1 %v701_v22 }
  0x2f   :  { %616 = vmatprep.subr.bf16.mxu1 %v702_v23 }
  0x30   :  { %665 = vmatpush3.bf16.msra.mxu0 %v709_v29 }
  0x31   :  { %575 = vmatmul.mubr.msk.bf16.gmra.mrb[12].mxu0 %vm87_vm1, %v687_v19  ;;  %666 = vmatprep.subr.bf16.mxu0 %v710_v30 }
  0x32   :  { %617 = vmatpush3.bf16.msra.mxu1 %v703_v24 }
  0x34   :  { %667 = vmatpush3.bf16.msra.mxu0 %v710_v30 }
  0x35   :  { %668 = vmatprep.subr.bf16.mxu0 %v711_v31 }
  0x38   :  { %669 = vmatpush3.bf16.msra.mxu0 %v711_v31 }
  0xec   :  { %v141_v35 = vpop.f32.mrb[0].mxu0 }
  0xed   :  { %v142_v36 = vadd.f32 %v141_v35, %v55_v33  ;;  %v143_v37 = vpop.f32.mrb[1].mxu0 }
  0xee   :  { %v144_v38 = vadd.f32 %v143_v37, %v59_v34  ;;  %v145_v39 = vpop.f32.mrb[2].mxu0 }
  0xef   :  { %v146_v40 = vadd.f32 %v145_v39, %v55_v33  ;;  %v147_v41 = vpop.f32.mrb[3].mxu0  ;;  %v180_v43 = vmax.f32 %v142_v36, 0.0 }
  0xf0   :  { %v148_v42 = vadd.f32 %v147_v41, %v59_v34  ;;  %v181_v45 = vmax.f32 %v144_v38, 0.0 }
  0xf1   :  { %v182_v44 = vmax.f32 %v146_v40, 0.0 }
  0xf2   :  { %v183_v46 = vmax.f32 %v148_v42, 0.0 }
  0xf3   :  { %v196_v47 = vpack.c.bf16 %v182_v44, %v180_v43 }
  0xf4   :  { %v151_v48 = vpop.f32.mrb[4].mxu0  ;;  %v197_v49 = vpack.c.bf16 %v183_v46, %v181_v45 }
  0xf5   :  { %v152_v50 = vadd.f32 %v151_v48, %v55_v33  ;;  %v153_v51 = vpop.f32.mrb[5].mxu0 }
  0xf6   :  { %v154_v52 = vadd.f32 %v153_v51, %v59_v34  ;;  %v155_v53 = vpop.f32.mrb[6].mxu0  ;;  %371 = vmatprep.mubr.bf16.mxu1 %v197_v49 }
  0xf7   :  { %v156_v54 = vadd.f32 %v155_v53, %v55_v33  ;;  %v157_v55 = vpop.f32.mrb[7].mxu0  ;;  %372 = vmatmul.mubr.bf16.vlgmr.msra.gmra.mrb[0].mxu1 %v196_v47  ;;  %v184_v57 = vmax.f32 %v152_v50, 0.0 }
  0xf8   :  { %v158_v56 = vadd.f32 %v157_v55, %v59_v34  ;;  %v185_v59 = vmax.f32 %v154_v52, 0.0 }
  0xf9   :  { %v186_v58 = vmax.f32 %v156_v54, 0.0 }
  0xfa   :  { %v187_v60 = vmax.f32 %v158_v56, 0.0 }
  0xfb   :  { %v198_v61 = vpack.c.bf16 %v186_v58, %v184_v57 }
  0xfc   :  { %v199_v62 = vpack.c.bf16 %v187_v60, %v185_v59  ;;  %v161_v63 = vpop.f32.mrb[8].mxu0 }
  0xfd   :  { %v162_v0 = vadd.f32 %v161_v63, %v55_v33  ;;  %v163_v1 = vpop.f32.mrb[9].mxu0 }
  0xfe   :  { %v164_v2 = vadd.f32 %v163_v1, %v59_v34  ;;  %v165_v3 = vpop.f32.mrb[10].mxu0  ;;  %379 = vmatprep.mubr.bf16.mxu1 %v199_v62 }
  0xff   :  { %v166_v4 = vadd.f32 %v165_v3, %v55_v33  ;;  %v167_v5 = vpop.f32.mrb[11].mxu0  ;;  %380 = vmatmul.mubr.bf16.gmra.mrb[4].mxu1 %v198_v61  ;;  %v188_v7 = vmax.f32 %v162_v0, 0.0 }
 0x100   :  { %v168_v6 = vadd.f32 %v167_v5, %v59_v34  ;;  %v189_v9 = vmax.f32 %v164_v2, 0.0 }
 0x101   :  { %v190_v8 = vmax.f32 %v166_v4, 0.0 }
 0x102   :  { %v191_v10 = vmax.f32 %v168_v6, 0.0 }
 0x103   :  { %v200_v11 = vpack.c.bf16 %v190_v8, %v188_v7 }
 0x104   :  { %v201_v12 = vpack.c.bf16 %v191_v10, %v189_v9  ;;  %v171_v13 = vpop.f32.mrb[12].mxu0 }
 0x105   :  { %v172_v14 = vadd.f32 %v171_v13, %v55_v33  ;;  %v173_v15 = vpop.f32.mrb[13].mxu0  ;;  %v593_v13 = vld [vmem:[%s874_s6] ss:$0 sm:$0xff] }
 0x106   :  { %v174_v16 = vadd.f32 %v173_v15, %v59_v34  ;;  %v175_v17 = vpop.f32.mrb[14].mxu0  ;;  %387 = vmatprep.mubr.bf16.mxu1 %v201_v12 }
 0x107   :  { %v176_v18 = vadd.f32 %v175_v17, %v55_v33  ;;  %v177_v19 = vpop.f32.mrb[15].mxu0  ;;  %388 = vmatmul.mubr.bf16.gmra.mrb[8].mxu1 %v200_v11  ;;  %v192_v21 = vmax.f32 %v172_v14, 0.0  ;;  %v576_v33 = vld [vmem:[%s872_s4] ss:$0 sm:$0xff] }
 0x108   :  { %v178_v20 = vadd.f32 %v177_v19, %v59_v34  ;;  %v193_v23 = vmax.f32 %v174_v16, 0.0 }
 0x109   :  { %v194_v22 = vmax.f32 %v176_v18, 0.0 }
 0x10a   :  { %v195_v24 = vmax.f32 %v178_v20, 0.0 }
 0x10b   :  { %v202_v25 = vpack.c.bf16 %v194_v22, %v192_v21 }
 0x10c   :  { %v203_v26 = vpack.c.bf16 %v195_v24, %v193_v23 }
 0x10e   :  { %395 = vmatprep.mubr.bf16.mxu1 %v203_v26 }
 0x10f   :  { %396 = vmatmul.mubr.bf16.gmra.mrb[12].mxu1 %v202_v25 }
 0x1ca   :  { %v618_v32 = vpop.f32.mrb[0].mxu1 }
 0x1cb   :  { %v619_v34 = vpop.f32.mrb[1].mxu1 }
 0x1cc   :  { %v620_v35 = vadd.f32 %v619_v34, %v618_v32  ;;  %v621_v36 = vpop.f32.mrb[2].mxu1 }
 0x1cd   :  { %v622_v37 = vpop.f32.mrb[3].mxu1 }
 0x1ce   :  { %v374_v38 = vadd.f32 %v620_v35, %v576_v33  ;;  %v623_v39 = vadd.f32 %v622_v37, %v621_v36 }
 0x1d0   :  { %v377_v40 = vadd.f32 %v623_v39, %v576_v33  ;;  %v404_v41 = vmax.f32 %v374_v38, 0.0 }
 0x1d2   :  { %v405_v42 = vmax.f32 %v377_v40, 0.0  ;;  %v624_v43 = vpop.f32.mrb[4].mxu1 }
 0x1d3   :  { %v625_v44 = vpop.f32.mrb[5].mxu1 }
 0x1d4   :  { %v626_v45 = vadd.f32 %v625_v44, %v624_v43  ;;  %v627_v46 = vpop.f32.mrb[6].mxu1  ;;  %v412_v47 = vpack.c.bf16 %v405_v42, %v404_v41 }
 0x1d5   :  { %v628_v48 = vpop.f32.mrb[7].mxu1 }
 0x1d6   :  { %v382_v49 = vadd.f32 %v626_v45, %v576_v33  ;;  %v629_v50 = vadd.f32 %v628_v48, %v627_v46  ;;  %670 = vmatprep.mubr.bf16.mxu0 %v412_v47 }
 0x1d8   :  { %v385_v51 = vadd.f32 %v629_v50, %v576_v33  ;;  %v406_v52 = vmax.f32 %v382_v49, 0.0 }
 0x1da   :  { %v407_v53 = vmax.f32 %v385_v51, 0.0  ;;  %v630_v54 = vpop.f32.mrb[8].mxu1 }
 0x1db   :  { %v631_v55 = vpop.f32.mrb[9].mxu1 }
 0x1dc   :  { %v413_v56 = vpack.c.bf16 %v407_v53, %v406_v52  ;;  %v632_v57 = vadd.f32 %v631_v55, %v630_v54  ;;  %v633_v58 = vpop.f32.mrb[10].mxu1 }
 0x1dd   :  { %v634_v59 = vpop.f32.mrb[11].mxu1 }
 0x1de   :  { %v390_v60 = vadd.f32 %v632_v57, %v576_v33  ;;  %v635_v61 = vadd.f32 %v634_v59, %v633_v58  ;;  %671 = vmatmul.mubr.bf16.vlgmr.msra.gmra.mrb[16].mxu0 %v413_v56 }
 0x1e0   :  { %v393_v62 = vadd.f32 %v635_v61, %v576_v33  ;;  %v408_v63 = vmax.f32 %v390_v60, 0.0 }
 0x1e2   :  { %v409_v0 = vmax.f32 %v393_v62, 0.0  ;;  %v636_v1 = vpop.f32.mrb[12].mxu1 }
 0x1e3   :  { %v637_v2 = vpop.f32.mrb[13].mxu1 }
 0x1e4   :  { %v638_v3 = vadd.f32 %v637_v2, %v636_v1  ;;  %v639_v4 = vpop.f32.mrb[14].mxu1  ;;  %v414_v5 = vpack.c.bf16 %v409_v0, %v408_v63 }
 0x1e5   :  { %v640_v6 = vpop.f32.mrb[15].mxu1 }
 0x1e6   :  { %v398_v7 = vadd.f32 %v638_v3, %v576_v33  ;;  %v641_v8 = vadd.f32 %v640_v6, %v639_v4  ;;  %674 = vmatprep.mubr.bf16.mxu0 %v414_v5 }
 0x1e8   :  { %v401_v9 = vadd.f32 %v641_v8, %v576_v33  ;;  %v410_v10 = vmax.f32 %v398_v7, 0.0 }
 0x1ea   :  { %v411_v11 = vmax.f32 %v401_v9, 0.0 }
 0x1ec   :  { %v415_v12 = vpack.c.bf16 %v411_v11, %v410_v10 }
 0x1ee   :  { %675 = vmatmul.mubr.bf16.gmra.mrb[20].mxu0 %v415_v12 }
 0x2b1   :  { %v672_v14 = vpop.f32.mrb[16].mxu0 }
 0x2b2   :  { %v530_v15 = vadd.f32 %v672_v14, %v593_v13  ;;  %v521_v16 = vpop.f32.mrb[17].mxu0 }
 0x2b3   :  { %v522_v17 = vadd.f32 %v593_v13, %v521_v16  ;;  %v673_v18 = vpop.f32.mrb[18].mxu0 }
 0x2b4   :  { %554 = vst [vmem:[%s875_s7 + $0x10] sm:$0xff] %v530_v15  ;;  %v533_v19 = vadd.f32 %v673_v18, %v593_v13  ;;  %v524_v20 = vpop.f32.mrb[19].mxu0 }
 0x2b5   :  { %552 = vst [vmem:[%s875_s7] sm:$0xff] %v522_v17  ;;  %v525_v21 = vadd.f32 %v593_v13, %v524_v20 }
 0x2b6   :  { %555 = vst [vmem:[%s875_s7 + $0x18] sm:$0xff] %v533_v19 }
 0x2b7   :  { %553 = vst [vmem:[%s875_s7 + $0x8] sm:$0xff] %v525_v21 }
 0x2c1   :  { %v676_v22 = vpop.f32.mrb[20].mxu0 }
 0x2c2   :  { %v546_v23 = vadd.f32 %v676_v22, %v593_v13  ;;  %v537_v24 = vpop.f32.mrb[21].mxu0 }
 0x2c3   :  { %v538_v25 = vadd.f32 %v593_v13, %v537_v24  ;;  %v677_v26 = vpop.f32.mrb[22].mxu0 }
 0x2c4   :  { %558 = vst [vmem:[%s875_s7 + $0x30] sm:$0xff] %v546_v23  ;;  %v549_v27 = vadd.f32 %v677_v26, %v593_v13  ;;  %v540_v28 = vpop.f32.mrb[23].mxu0 }
 0x2c5   :  { %556 = vst [vmem:[%s875_s7 + $0x20] sm:$0xff] %v538_v25  ;;  %v541_v29 = vadd.f32 %v593_v13, %v540_v28 }
 0x2c6   :  { %559 = vst [vmem:[%s875_s7 + $0x38] sm:$0xff] %v549_v27 }
 0x2c7   :  { %557 = vst [vmem:[%s875_s7 + $0x28] sm:$0xff] %v541_v29 }
 0x2c8   :  { %564 = vsyncpa [#allocation3], 1 }

</bundles_post_ra>
